<compile_context>
chip_gen: v7x
topology: tpu7x:2x2x1
jax: 0.10.0
libtpu: 0.0.40
codegen_flags: <defaults>
</compile_context>

<pallas_src>
import functools
import math

import jax
import jax.numpy as jnp
from jax import lax
from jax.experimental import pallas as pl
from jax.experimental.pallas import tpu as pltpu


# ----------------------------------------------------------------- utilities
def _round_up(x, m):
    return ((x + m - 1) // m) * m


def _pick_tile(dim, candidates):
    for c in candidates:
        if dim % c == 0:
            return c
    return candidates[-1]


# ------------------------------------------------- Pallas matmul+bias+ReLU
def _matmul_bias_act_kernel(x_ref, w_ref, b_ref, o_ref, acc_ref, *, activated):
    """One (TM, TN) tile of  act(X @ W + b).

    Grid = (M/TM, N/TN, K/TK); K (last axis) is the reduction axis, acc_ref is
    a VMEM f32 scratch accumulator resident across the K steps.
    """
    @pl.when(pl.program_id(2) == 0)
    def _init():
        acc_ref[...] = jnp.zeros_like(acc_ref)

    acc_ref[...] += jnp.dot(x_ref[...], w_ref[...],
                            preferred_element_type=jnp.float32)

    @pl.when(pl.program_id(2) == pl.num_programs(2) - 1)
    def _finalize():
        out = acc_ref[...] + b_ref[...].astype(jnp.float32)
        if activated:
            out = jnp.maximum(out, 0.0)
        o_ref[...] = out.astype(o_ref.dtype)


def matmul_bias_act(x, w, b, *, activated=True, operand_dtype=jnp.bfloat16):
    """act(x @ w + b) as a lane-dense, MXU-friendly tiled Pallas kernel.

    x: (M, K) activations (im2col patches), w: (K, N), b: (N,) f32.
    Returns (M, N) float32.
    """
    M, K = x.shape
    K2, N = w.shape
    assert K == K2 and b.shape == (N,)

    # Pad so every store is an unmasked lane-dense vst and every MXU push has
    # a >=128-deep contraction.
    TM = min(256, _round_up(M, 32))
    M_pad = _round_up(M, TM)
    K_pad = _round_up(K, 128)
    TK = _pick_tile(K_pad, (512, 384, 256, 128))
    N_pad = _round_up(N, 128)
    TN = _pick_tile(N_pad, (512, 256, 128))

    xp = jnp.pad(x.astype(operand_dtype), ((0, M_pad - M), (0, K_pad - K)))
    wp = jnp.pad(w.astype(operand_dtype), ((0, K_pad - K), (0, N_pad - N)))
    bp = jnp.pad(b.astype(jnp.float32), (0, N_pad - N)).reshape(1, N_pad)

    grid = (M_pad // TM, N_pad // TN, K_pad // TK)

    out = pl.pallas_call(
        functools.partial(_matmul_bias_act_kernel, activated=activated),
        out_shape=jax.ShapeDtypeStruct((M_pad, N_pad), jnp.float32),
        grid_spec=pltpu.PrefetchScalarGridSpec(
            num_scalar_prefetch=0,
            grid=grid,
            in_specs=[
                pl.BlockSpec((TM, TK), lambda i, j, k: (i, k)),
                pl.BlockSpec((TK, TN), lambda i, j, k: (k, j)),
                pl.BlockSpec((1, TN), lambda i, j, k: (0, j)),
            ],
            out_specs=pl.BlockSpec((TM, TN), lambda i, j, k: (i, j)),
            scratch_shapes=[pltpu.VMEM((TM, TN), jnp.float32)],
        ),
        compiler_params=pltpu.CompilerParams(
            dimension_semantics=("parallel", "parallel", "arbitrary"),
            vmem_limit_bytes=64 * 1024 * 1024,
        ),
    )(xp, wp, bp)

    return out[:M, :N]


# --------------------------------------------- conv3x3 (pad=1) + bias + ReLU
def conv3x3_relu(x_nhwc, weight, bias, *, activated=True,
                 operand_dtype=jnp.bfloat16):
    """3x3 zero-padded conv (padding=1) + bias (+ReLU), NHWC activations.

    weight: PyTorch layout (Cout, Cin, 3, 3); bias: (Cout,).
    im2col in the wrapper -> single tiled matmul in Pallas.
    """
    B, H, W, Cin = x_nhwc.shape
    Cout, Cin_w, KH, KW = weight.shape
    assert Cin == Cin_w and (KH, KW) == (3, 3)

    # Cast early so the im2col slab is materialized in bf16 (half HBM traffic).
    xc = x_nhwc.astype(operand_dtype)
    xp = jnp.pad(xc, ((0, 0), (1, 1), (1, 1), (0, 0)))
    cols = [xp[:, kh:kh + H, kw:kw + W, :]
            for kh in range(KH) for kw in range(KW)]
    patches = jnp.concatenate(cols, axis=-1).reshape(B * H * W, KH * KW * Cin)

    # (Cout, Cin, KH, KW) -> (KH*KW*Cin, Cout), matching patch channel order.
    w_mat = jnp.transpose(weight, (2, 3, 1, 0)).reshape(KH * KW * Cin, Cout)

    out = matmul_bias_act(patches, w_mat, bias,
                          activated=activated, operand_dtype=operand_dtype)
    return out.reshape(B, H, W, Cout)


# -------------------------------------------------------------- 2x2 max-pool
def _max4_kernel(a_ref, b_ref, c_ref, d_ref, o_ref):
    o_ref[...] = jnp.maximum(jnp.maximum(a_ref[...], b_ref[...]),
                             jnp.maximum(c_ref[...], d_ref[...]))


def max_pool_2x2(x_nhwc):
    """MaxPool2d(kernel_size=2, stride=2) on NHWC."""
    B, H, W, C = x_nhwc.shape
    Ho, Wo = H // 2, W // 2
    x00 = x_nhwc[:, 0::2, 0::2, :]
    x01 = x_nhwc[:, 0::2, 1::2, :]
    x10 = x_nhwc[:, 1::2, 0::2, :]
    x11 = x_nhwc[:, 1::2, 1::2, :]
    flat = lambda t: t.reshape(B * Ho, Wo * C)   # lane-dense 2-D slab
    out = pl.pallas_call(
        _max4_kernel,
        out_shape=jax.ShapeDtypeStruct((B * Ho, Wo * C), x_nhwc.dtype),
    )(flat(x00), flat(x01), flat(x10), flat(x11))
    return out.reshape(B, Ho, Wo, C)


# ------------------------------------------------------------ VGG19 encoder
# vgg19.features[:21] conv layers (all 3x3, padding=1, each followed by ReLU).
_VGG_CONVS = [
    (3, 64),     # conv1_1  (slice1)
    (64, 64),    # conv1_2  (slice2)
    (64, 128),   # conv2_1  (slice2)
    (128, 128),  # conv2_2  (slice3)
    (128, 256),  # conv3_1  (slice3)
    (256, 256),  # conv3_2  (slice4)
    (256, 256),  # conv3_3  (slice4)
    (256, 256),  # conv3_4  (slice4)
    (256, 512),  # conv4_1  (slice4)
]

# slice1 = features[:2], slice2 = [2:7], slice3 = [7:12], slice4 = [12:21]
_SLICES = (
    (("conv", 0),),
    (("conv", 1), ("pool",), ("conv", 2)),
    (("conv", 3), ("pool",), ("conv", 4)),
    (("conv", 5), ("conv", 6), ("conv", 7), ("pool",), ("conv", 8)),
)


def init_vgg_encoder_params(key):
    # TODO(synk): pretrained torchvision VGG19 ImageNet weights cannot be
    # downloaded in-sandbox; deterministic He-initialized weights with the
    # exact same layer structure are used instead.
    params = []
    for cin, cout in _VGG_CONVS:
        key, kw, kb = jax.random.split(key, 3)
        std = math.sqrt(2.0 / (cin * 9))
        w = std * jax.random.normal(kw, (cout, cin, 3, 3), jnp.float32)
        b = 0.1 * jax.random.normal(kb, (cout,), jnp.float32)
        params.append((w, b))
    return params


def _run_ops(x, ops, params, conv_fn, pool_fn):
    for op in ops:
        if op[0] == "conv":
            w, b = params[op[1]]
            x = conv_fn(x, w, b)
        else:
            x = pool_fn(x)
    return x


@functools.partial(jax.jit, static_argnames=("output_middle_feature_only",))
def vgg_encoder_forward(images_nchw, params, output_middle_feature_only=False):
    """Pallas VGGEncoder.forward: NCHW in, NCHW out (matches the nn.Module)."""
    x = jnp.transpose(images_nchw, (0, 2, 3, 1))        # NCHW -> NHWC
    conv = functools.partial(conv3x3_relu, operand_dtype=jnp.bfloat16)
    h1 = _run_ops(x, _SLICES[0], params, conv, max_pool_2x2)
    h2 = _run_ops(h1, _SLICES[1], params, conv, max_pool_2x2)
    h3 = _run_ops(h2, _SLICES[2], params, conv, max_pool_2x2)
    h4 = _run_ops(h3, _SLICES[3], params, conv, max_pool_2x2)
    to_nchw = lambda t: jnp.transpose(t, (0, 3, 1, 2))
    if output_middle_feature_only:
        return to_nchw(h1), to_nchw(h2), to_nchw(h3)
    return to_nchw(h4)


# ------------------------------------------------------ pure-JAX references
def _conv3x3_relu_ref(x_nhwc, weight, bias, operand_dtype=jnp.bfloat16):
    out = lax.conv_general_dilated(
        x_nhwc.astype(operand_dtype), weight.astype(operand_dtype),
        window_strides=(1, 1), padding=((1, 1), (1, 1)),
        dimension_numbers=("NHWC", "OIHW", "NHWC"),
        preferred_element_type=jnp.float32)
    return jnp.maximum(out + bias[None, None, None, :].astype(jnp.float32), 0.0)


def _max_pool_2x2_ref(x_nhwc):
    B, H, W, C = x_nhwc.shape
    return x_nhwc.reshape(B, H // 2, 2, W // 2, 2, C).max(axis=(2, 4))


@functools.partial(jax.jit, static_argnames=("output_middle_feature_only",))
def vgg_encoder_reference(images_nchw, params, output_middle_feature_only=False):
    x = jnp.transpose(images_nchw, (0, 2, 3, 1))
    h1 = _run_ops(x, _SLICES[0], params, _conv3x3_relu_ref, _max_pool_2x2_ref)
    h2 = _run_ops(h1, _SLICES[1], params, _conv3x3_relu_ref, _max_pool_2x2_ref)
    h3 = _run_ops(h2, _SLICES[2], params, _conv3x3_relu_ref, _max_pool_2x2_ref)
    h4 = _run_ops(h3, _SLICES[3], params, _conv3x3_relu_ref, _max_pool_2x2_ref)
    to_nchw = lambda t: jnp.transpose(t, (0, 3, 1, 2))
    if output_middle_feature_only:
        return to_nchw(h1), to_nchw(h2), to_nchw(h3)
    return to_nchw(h4)


# --------------------------------------------------------------------- main
if __name__ == "__main__":
    B, C, H, W = 2, 3, 16, 16
    key = jax.random.PRNGKey(0)
    k_img, k_par = jax.random.split(key)
    images = jax.random.normal(k_img, (B, C, H, W), jnp.float32)
    params = init_vgg_encoder_params(k_par)

    # --- single-layer check (identical bf16 operands => tight tolerance) ---
    w0, b0 = params[0]
    x_nhwc = jnp.transpose(images, (0, 2, 3, 1))
    y_pal = jax.block_until_ready(conv3x3_relu(x_nhwc, w0, b0))
    y_ref = _conv3x3_relu_ref(x_nhwc, w0, b0)
    assert jnp.allclose(y_pal, y_ref, atol=1e-4, rtol=1e-4), \
        float(jnp.max(jnp.abs(y_pal - y_ref)))

    # --- full encoder: h4 and (h1, h2, h3) paths ---------------------------
    h4 = jax.block_until_ready(vgg_encoder_forward(images, params))
    h1, h2, h3 = vgg_encoder_forward(images, params,
                                     output_middle_feature_only=True)
    jax.block_until_ready(h3)

    r4 = vgg_encoder_reference(images, params)
    r1, r2, r3 = vgg_encoder_reference(images, params,
                                       output_middle_feature_only=True)

    assert h1.shape == (B, 64, H, W)
    assert h2.shape == (B, 128, H // 2, W // 2)
    assert h3.shape == (B, 256, H // 4, W // 4)
    assert h4.shape == (B, 512, H // 8, W // 8)
    # Both paths use bf16 MXU operands; tolerance covers bf16 re-rounding
    # drift accumulated through the 9-conv chain.
    for got, want in ((h1, r1), (h2, r2), (h3, r3), (h4, r4)):
        assert jnp.allclose(got, want, atol=5e-2, rtol=5e-2), \
            float(jnp.max(jnp.abs(got - want)))

    print("KERNEL_OK")
</pallas_src>

<mosaic_0001>
module attributes {stable_mosaic.version = 11 : i64} {
  func.func @_matmul_bias_act_kernel(%arg0: i32, %arg1: i32, %arg2: i32, %arg3: memref<256x128xbf16, #tpu.memory_space<vmem>>, %arg4: memref<128x128xbf16, #tpu.memory_space<vmem>>, %arg5: memref<1x128xf32, #tpu.memory_space<vmem>>, %arg6: memref<256x128xf32, #tpu.memory_space<vmem>>, %arg7: memref<256x128xf32, #tpu.memory_space<vmem>>) attributes {dimension_semantics = [#tpu.dimension_semantics<parallel>, #tpu.dimension_semantics<parallel>, #tpu.dimension_semantics<arbitrary>], iteration_bounds = array<i64: 2, 1, 1>, scalar_prefetch = 0 : i64, scratch_operands = 1 : i64, tpu.core_type = #tpu.core_type<tc>, window_params = [{transform_indices = @transform_0, window_bounds = array<i64: 256, 128>}, {transform_indices = @transform_1, window_bounds = array<i64: 128, 128>}, {transform_indices = @transform_2, window_bounds = array<i64: 1, 128>}, {transform_indices = @transform_3, window_bounds = array<i64: 256, 128>}]} {
    %c0_i32 = arith.constant 0 : i32
    %0 = arith.cmpi eq, %arg2, %c0_i32 : i32
    %1 = arith.extui %0 : i1 to i32
    %c0_i32_0 = arith.constant 0 : i32
    %2 = arith.cmpi ne, %1, %c0_i32_0 : i32
    scf.if %2 {
      %cst_10 = arith.constant 0.000000e+00 : f32
      %12 = vector.broadcast %cst_10 : f32 to vector<256x128xf32>
      %c0_11 = arith.constant 0 : index
      %c0_12 = arith.constant 0 : index
      %13 = vector.load %arg7[%c0_11, %c0_12] : memref<256x128xf32, #tpu.memory_space<vmem>>, vector<256x128xf32>
      tpu.vector_store %arg7[%c0_11, %c0_12], %12 {strides = array<i32>} : memref<256x128xf32, #tpu.memory_space<vmem>>, vector<256x128xf32>,
    } else {
    }
    %c0 = arith.constant 0 : index
    %c0_1 = arith.constant 0 : index
    %3 = vector.load %arg7[%c0, %c0_1] : memref<256x128xf32, #tpu.memory_space<vmem>>, vector<256x128xf32>
    %c0_2 = arith.constant 0 : index
    %c0_3 = arith.constant 0 : index
    %4 = vector.load %arg3[%c0_2, %c0_3] : memref<256x128xbf16, #tpu.memory_space<vmem>>, vector<256x128xbf16>
    %c0_4 = arith.constant 0 : index
    %c0_5 = arith.constant 0 : index
    %5 = vector.load %arg4[%c0_4, %c0_5] : memref<128x128xbf16, #tpu.memory_space<vmem>>, vector<128x128xbf16>
    %cst = arith.constant dense<0.000000e+00> : vector<256x128xf32>
    %6 = tpu.matmul %4, %5, %cst {dimension_numbers = #tpu.dot_dimension_numbers<[1], [0], [0], [1], [0, 0, 1, 1], [], []>} : vector<256x128xbf16>, vector<128x128xbf16>, vector<256x128xf32> -> vector<256x128xf32>
    %7 = arith.addf %3, %6 : vector<256x128xf32>
    %c0_6 = arith.constant 0 : index
    %c0_7 = arith.constant 0 : index
    %8 = vector.load %arg7[%c0_6, %c0_7] : memref<256x128xf32, #tpu.memory_space<vmem>>, vector<256x128xf32>
    tpu.vector_store %arg7[%c0_6, %c0_7], %7 {strides = array<i32>} : memref<256x128xf32, #tpu.memory_space<vmem>>, vector<256x128xf32>,
    %c0_i32_8 = arith.constant 0 : i32
    %9 = arith.cmpi eq, %arg2, %c0_i32_8 : i32
    %10 = arith.extui %9 : i1 to i32
    %c0_i32_9 = arith.constant 0 : i32
    %11 = arith.cmpi ne, %10, %c0_i32_9 : i32
    scf.if %11 {
      %c0_10 = arith.constant 0 : index
      %c0_11 = arith.constant 0 : index
      %12 = vector.load %arg7[%c0_10, %c0_11] : memref<256x128xf32, #tpu.memory_space<vmem>>, vector<256x128xf32>
      %c0_12 = arith.constant 0 : index
      %c0_13 = arith.constant 0 : index
      %13 = vector.load %arg5[%c0_12, %c0_13] : memref<1x128xf32, #tpu.memory_space<vmem>>, vector<1x128xf32>
      %14 = vector.broadcast %13 : vector<1x128xf32> to vector<256x128xf32>
      %15 = arith.addf %12, %14 : vector<256x128xf32>
      %cst_14 = arith.constant 0.000000e+00 : f32
      %16 = vector.broadcast %cst_14 : f32 to vector<256x128xf32>
      %17 = arith.maximumf %15, %16 : vector<256x128xf32>
      %c0_15 = arith.constant 0 : index
      %c0_16 = arith.constant 0 : index
      %18 = vector.load %arg6[%c0_15, %c0_16] : memref<256x128xf32, #tpu.memory_space<vmem>>, vector<256x128xf32>
      tpu.vector_store %arg6[%c0_15, %c0_16], %17 {strides = array<i32>} : memref<256x128xf32, #tpu.memory_space<vmem>>, vector<256x128xf32>,
    } else {
    }
    return
  }
  func.func @transform_0(%arg0: i32, %arg1: i32, %arg2: i32) -> (i32, i32) {
    %c0_i32 = arith.constant 0 : i32
    return %arg0, %arg2 : i32, i32
  }
  func.func @transform_1(%arg0: i32, %arg1: i32, %arg2: i32) -> (i32, i32) {
    %c0_i32 = arith.constant 0 : i32
    return %arg2, %arg1 : i32, i32
  }
  func.func @transform_2(%arg0: i32, %arg1: i32, %arg2: i32) -> (i32, i32) {
    %c0_i32 = arith.constant 0 : i32
    %c0_i32_0 = arith.constant 0 : i32
    return %c0_i32, %arg1 : i32, i32
  }
  func.func @transform_3(%arg0: i32, %arg1: i32, %arg2: i32) -> (i32, i32) {
    %c0_i32 = arith.constant 0 : i32
    return %arg0, %arg1 : i32, i32
  }
}

</mosaic_0001>

<bundles_post_ra>
// kernel: tpu_custom_call.1
= control target key start
LH: loop header
LB: loop body
LE: loop exit
PB: predicated region body
PF: predicated region fallthrough
CT: control target
= control target key end

     0   :  { %8 = vsyncpa [#allocation4], 0  ;;  %s1810_s0 = inlined_call_operand.hbm [shape: bf16[512,128], index: 0, kind: input, shape index: {}]   ;;  %s1811_s1 = inlined_call_operand.hbm [shape: bf16[128,128], index: 1, kind: input, shape index: {}]   ;;  %s1812_s2 = inlined_call_operand.hbm [shape: f32[1,128], index: 2, kind: input, shape index: {}]   ;;  %s1813_s3 = inlined_call_operand.hbm [shape: f32[512,128], index: 3, kind: output, shape index: {}]  }
   0x1   :  { %10 = vsyncpa [#allocation4 + $0x1], 0 }
   0x2   :  { %11 = vsyncpa [#allocation7], 0 }
   0x3   :  { %12 = vsyncpa [#allocation5], 0 }
   0x4   :  { %14 = vsyncpa [#allocation5 + $0x1], 0  ;;  %s1460_s12 = smov 0   ;;  %s1462_s13 = smov 0  }
   0x5   :  { %s1464_s14 = smov 0   ;;  %s1466_s15 = smov 0  }
   0x6   :  { %s1468_s16 = smov 0   ;;  %s1470_s17 = smov 0  }
   0x7 LB: > { %s1013_s18 = sadd.s32 4294967295, %s1430_s17   ;;  %s1014_s19 = sadd.s32 4294967294, %s1430_s17   ;;  %s1430_s17 = sphi %s1470_s17, %s20_s17   ;;  %s1426_s16 = sphi %s1468_s16, %s1835_s16   ;;  %s1422_s15 = sphi %s1466_s15, %s1834_s15   ;;  %s1418_s14 = sphi %s1464_s14, %s1833_s14   ;;  %s1414_s13 = sphi %s1462_s13, %s1832_s13   ;;  %s1410_s12 = sphi %s1460_s12, %s1831_s12  }
   0x8   : > { %p61_p0 = scmp.ne.s32.totalorder %s1414_s13, %s1410_s12  ;;  %p1494_p1 = scmp.eq.s32.totalorder %s1013_s18, 0 }
   0x9   : > { %p1498_p2 = scmp.eq.s32.totalorder %s1013_s18, 1  ;;  %p147_p3 = scmp.eq.s32.totalorder %s1014_s19, 1 }
   0xa   : > { %s1818_s20 = scalar_select %p1494_p1, 1, 0 }
   0xb   : > { %p1504_p4 = por %p1494_p1, %p61_p0  ;;  %p1015_p5 = scmp.ge.s32.totalorder %s1430_s17, 1 }
   0xc   : > { %p1509_p6 = por %p147_p3, %p61_p0  ;;  %p154_p7 = scmp.lt.s32.totalorder %s1430_s17, 3 }
   0xd   : > { %s1820_s22 = scalar_select %p1504_p4, 1, 0 }
   0xe   : > { %s1821_s23 = scalar_select %p1509_p6, 1, 0 }
   0xf   : > { %p1514_p8 = pnand %p1015_p5, %p154_p7  ;;  %s1432_s25 = smov [#allocation6]  }
  0x10   : > { %s170_s26 = sshll.u32 %s1432_s25, 4  ;;  %s1433_s28 = smov [#allocation8]   ;;  %s1518_s26 = int_to_ptr.vmem [resolvable:$true] %s170_s26 }
  0x11   : > { %p1159_p9 = pneg %p1514_p8  ;;  %s186_s29 = sshll.u32 %s1433_s28, 4  ;;  %s1529_s29 = int_to_ptr.vmem [resolvable:$true] %s186_s29 }
  0x12   : > { %s1258_s5 = scalar_lea.hbm %s1811_s1, 1024 }
  0x13   : > { %p1525_p11 = pnand %p1159_p9, %p1494_p1  ;;  %p1259_p12 = scmp.ne.s32.totalorder %s1811_s1, %s1258_s5 }
  0x14   : > { %p1265_p5 = scmp.lt.u32.totalorder %s1258_s5, %s1811_s1 }
  0x15   : > { %p1260_p13 = pneg %p1525_p11 }
  0x17   : > { %p1261_p0 = pnand %p1260_p13, %p1259_p12 }
  0x19   : > { %p1262_p3 = pneg %p1261_p0 }
  0x1b   : > { %p1267_p7 = pnand %p1265_p5, %p1262_p3 }
  0x1d   : > { %1270 = shalt.err (!%p1267_p7)
}
  0x1e   : > { %s1271_s10 = scalar_lea.vmem %s1518_s26, 1024  ;;  %p1279_p1 = scmp.lt.s32.totalorder %s1518_s26, %s1518_s26 }
  0x1f   : > { %p1272_p9 = scmp.ne.s32.totalorder %s1518_s26, %s1271_s10  ;;  %p1280_p12 = scmp.lt.s32.totalorder %s1271_s10, %s1271_s10 }
  0x21   : > { %p1274_p10 = pnand %p1272_p9, %p1260_p13  ;;  %p1281_p0 = por %p1280_p12, %p1279_p1 }
  0x23   : > { %p1275_p6 = pneg %p1274_p10 }
  0x25   : > { %p1282_p4 = pnand %p1281_p0, %p1275_p6 }
  0x27   : > { %1285 = shalt.err (!%p1282_p4)
}
  0x28   : > { %s1434_s11 = smov 64   ;;  %s1435_s18 = smov 4  }
  0x29   : > { %1162 = dma.hbm_to_vmem [thread:$0]  (!%p1525_p11), %s1811_s1, 1024, %s1518_s26, [#allocation7], %s1434_s11, %s1434_s11, %s1435_s18  }
  0x2a   : > { %s1286_s4 = scalar_lea.hbm %s1812_s2, 16 }
  0x2b   : > { %p1287_p1 = scmp.ne.s32.totalorder %s1812_s2, %s1286_s4  ;;  %p1293_p10 = scmp.lt.u32.totalorder %s1286_s4, %s1812_s2 }
  0x2d   : > { %p1289_p4 = pnand %p1287_p1, %p1260_p13 }
  0x2f   : > { %p1290_p6 = pneg %p1289_p4 }
  0x31   : > { %p1295_p3 = pnand %p1293_p10, %p1290_p6 }
  0x33   : > { %1298 = shalt.err (!%p1295_p3)
}
  0x34   : > { %s1299_s26 = scalar_lea.vmem %s1529_s29, 16  ;;  %s1306_s9 = scalar_lea.vmem %s1529_s29, 32 }
  0x35   : > { %p1300_p5 = scmp.ne.s32.totalorder %s1529_s29, %s1299_s26  ;;  %p1307_p12 = scmp.lt.s32.totalorder %s1529_s29, %s1529_s29 }
  0x36   : > { %p1308_p0 = scmp.lt.s32.totalorder %s1306_s9, %s1299_s26 }
  0x37   : > { %p1302_p7 = pnand %p1300_p5, %p1260_p13 }
  0x38   : > { %p1309_p1 = por %p1308_p0, %p1307_p12 }
  0x39   : > { %p1303_p9 = pneg %p1302_p7 }
  0x3b   : > { %p1310_p4 = pnand %p1309_p1, %p1303_p9 }
  0x3d   : > { %1313 = shalt.err (!%p1310_p4)
}
  0x3e   : > { %1165 = dma.hbm_to_vmem [thread:$0]  (!%p1525_p11), %s1812_s2, 16, %s1529_s29, [#allocation7]  }
  0x3f   : > { %s39_s25 = sadd.s32 1, %s1426_s16  ;;  %s48_s28 = sadd.s32 1, %s1418_s14 }
  0x40   : > { %p41_p13 = scmp.ge.s32.totalorder %s39_s25, 2  ;;  %p55_p6 = scmp.ne.s32.totalorder %s1418_s14, %s1414_s13 }
  0x41   : > { %p56_p10 = scmp.eq.s32.totalorder %s1430_s17, 0  ;;  %p1176_p3 = scmp.lt.s32.totalorder %s1430_s17, 2 }
  0x42   : > { %s1837_s25 = smov (%p41_p13, %s39_s25), 0  ;;  %p1597_p7 = por %p1498_p2, %p55_p6 }
  0x43   : > { %p57_p5 = por %p56_p10, %p55_p6  ;;  %s43_s30 = ssub.s32 %s1426_s16, %s1837_s25 }
  0x44   : > { %s1824_s27 = scalar_select %p1597_p7, 1, 0 }
  0x45   : > { %s197_s4 = sand.u32 1, %s1418_s14   ;;  %p46_p9 = scmp.eq.s32.totalorder %s43_s30, 0 }
  0x46   : > { %s1019_s29 = sshll.u32 %s197_s4, 7  ;;  %s1057_s5 = sshll.u32 %s1426_s16, 11 }
  0x47   : > { %s1606_s6 = scalar_select %p46_p9, %s1418_s14, %s48_s28  }
  0x48   : > { %s1611_s26 = scalar_lea.hbm %s1810_s0, %s1057_s5  ;;  %s201_s21 = scalar_lea.vmem [#allocation3], %s1019_s29 }
  0x49   : > { %s209_s9 = sshll.u32 %s201_s21, 4  ;;  %p1615_p2 = pnand %p1176_p3, %p57_p5  ;;  %s1619_s9 = int_to_ptr.vmem [resolvable:$true] %s209_s9 }
  0x4a   : > { %s1621_s19 = scalar_lea.sflag [#allocation4], %s197_s4  ;;  %s1314_s28 = scalar_lea.hbm %s1611_s26, 2048 }
  0x4b   : > { %p1315_p11 = scmp.ne.s32.totalorder %s1611_s26, %s1314_s28  ;;  %p1316_p12 = pneg %p1615_p2 }
  0x4c   : > { %s1319_s5 = scalar_lea.hbm %s1810_s0, 4096  ;;  %p1320_p4 = scmp.lt.u32.totalorder %s1611_s26, %s1810_s0 }
  0x4d   : > { %p1317_p0 = pnand %p1316_p12, %p1315_p11  ;;  %p1321_p13 = scmp.lt.u32.totalorder %s1319_s5, %s1314_s28 }
  0x4e   : > { %p1323_p10 = scmp.lt.u32.totalorder %s1314_s28, %s1611_s26 }
  0x4f   : > { %p1318_p1 = pneg %p1317_p0  ;;  %p1322_p6 = por %p1321_p13, %p1320_p4 }
  0x51   : > { %p1324_p3 = por %p1323_p10, %p1322_p6 }
  0x53   : > { %p1325_p5 = pnand %p1324_p3, %p1318_p1 }
  0x55   : > { %1328 = shalt.err (!%p1325_p5)
}
  0x56   : > { %s1329_s4 = scalar_lea.vmem %s1619_s9, 2048  ;;  %s1436_s21 = smov [#allocation3]  }
  0x57   : > { %p1330_p9 = scmp.ne.s32.totalorder %s1619_s9, %s1329_s4  ;;  %s1334_s30 = sshll.u32 %s1436_s21, 4  ;;  %s1335_s30 = int_to_ptr.vmem [resolvable:$false] %s1334_s30 }
  0x58   : > { %s1336_s29 = scalar_lea.vmem %s1335_s30, 4096  ;;  %p1337_p7 = scmp.lt.s32.totalorder %s1619_s9, %s1335_s30 }
  0x59   : > { %p1332_p11 = pnand %p1330_p9, %p1316_p12  ;;  %p1338_p4 = scmp.lt.s32.totalorder %s1336_s29, %s1329_s4 }
  0x5b   : > { %p1333_p0 = pneg %p1332_p11  ;;  %p1339_p13 = por %p1338_p4, %p1337_p7 }
  0x5d   : > { %p1340_p6 = pnand %p1339_p13, %p1333_p0 }
  0x5f   : > { %1343 = shalt.err (!%p1340_p6)
}
  0x60   : > { %1169 = dma.hbm_to_vmem [thread:$0]  (!%p1615_p2), %s1611_s26, 2048, %s1619_s9, %s1621_s19, %s1434_s11, %s1434_s11, %s1435_s18  }
  0x61   : > { %221 = sbr.rel (%p1514_p8) target bundleno = 399 (0x18f), region = 32  ;;  %s1655_s28 = sand.u32 (!%p1514_p8), 1, %s1414_s13  }
  0x62   : > { %s1023_s5 = sshll.u32 (!%p1514_p8), %s1655_s28, 7  ;;  %s224_s7 = scalar_lea.sflag (!%p1514_p8), [#allocation4], %s1655_s28 }
  0x63   : > { %s1659_s8 = scalar_lea.vmem (!%p1514_p8), [#allocation3], %s1023_s5  ;;  %p1826_p7 = scmp.ne.s32.totalorder (!%p1514_p8), %s1820_s22, 0 }
  0x68   : > { %1397 = dma.done.wait (%p1826_p7), %s224_s7, 2048  }
  0x69   : > { %1399 = vsyncadd (%p1826_p7), %s224_s7, 4294965248  ;;  %p1827_p2 = scmp.ne.s32.totalorder %s1818_s20, 0 }
  0x6b   : > { %1401 = dma.done.wait (%p1827_p2), [#allocation7], 1040  }
  0x6c   : > { %1403 = vsyncadd (%p1827_p2), [#allocation7], 4294966256  ;;  %v1234_v0 = vld [vmem:[#allocation6] sm:$0xff]   ;;  %v1235_v1 = vld [vmem:[#allocation6 + $0x8] sm:$0xff]   ;;  %s1026_s20 = sshll.u32 %s1655_s28, 8  ;;  %s1058_s24 = sshll.u32 %s1422_s15, 12 }
  0x6d   : > { %1083 = vmatprep.subr.bf16.mxu0 %v1234_v0  ;;  %1131 = vmatprep.subr.bf16.mxu1 %v1234_v0  ;;  %v1236_v2 = vld [vmem:[#allocation6 + $0x10] sm:$0xff]   ;;  %v1237_v3 = vld [vmem:[#allocation6 + $0x18] sm:$0xff]   ;;  %v1242_v4 = vld [vmem:[%s1659_s8] sm:$0xff]   ;;  %s1696_s22 = scalar_lea.vmem [#allocation9], %s1026_s20  ;;  %s1753_s26 = scalar_lea.hbm %s1813_s3, %s1058_s24 }
  0x6e   : > { %1084 = vmatpush3.bf16.msra.mxu0 %v1234_v0  ;;  %1139 = vmatpush3.bf16.msra.mxu1 %v1234_v0  ;;  %v1243_v5 = vld [vmem:[%s1659_s8 + $0x40] sm:$0xff]   ;;  %v1239_v7 = vld [vmem:[#allocation6 + $0x28] sm:$0xff]   ;;  %v1240_v8 = vld [vmem:[#allocation6 + $0x30] sm:$0xff]   ;;  %s900_s11 = sshll.u32 %s1696_s22, 4  ;;  %s886_s9 = scalar_lea.sflag [#allocation5], %s1655_s28  ;;  %s1755_s11 = int_to_ptr.vmem [resolvable:$true] %s900_s11 }
  0x6f   : > { %1085 = vmatprep.subr.bf16.mxu0 %v1235_v1  ;;  %1132 = vmatprep.subr.bf16.mxu1 %v1235_v1  ;;  %v1238_v6 = vld [vmem:[#allocation6 + $0x20] sm:$0xff]   ;;  %v1241_v9 = vld [vmem:[#allocation6 + $0x38] sm:$0xff]   ;;  %v1244_v10 = vld [vmem:[%s1659_s8 + $0x8] sm:$0xff]   ;;  %s1344_s10 = scalar_lea.vmem %s1755_s11, 4096  ;;  %p1828_p12 = scmp.ne.s32.totalorder %s1824_s27, 0 }
  0x70   : > { %1099 = vmatprep.mubr.bf16.mxu0 %v1242_v4  ;;  %1115 = vmatprep.mubr.bf16.mxu1 %v1243_v5  ;;  %v1245_v11 = vld [vmem:[%s1659_s8 + $0x48] sm:$0xff]   ;;  %v1246_v12 = vld [vmem:[%s1659_s8 + $0x10] sm:$0xff]   ;;  %v1248_v14 = vld [vmem:[%s1659_s8 + $0x18] sm:$0xff]   ;;  %p1345_p8 = scmp.ne.s32.totalorder %s1755_s11, %s1344_s10  ;;  %s1437_s19 = smov [#allocation9]  }
  0x71   : > { %v1247_v13 = vld [vmem:[%s1659_s8 + $0x50] sm:$0xff]   ;;  %v1249_v15 = vld [vmem:[%s1659_s8 + $0x58] sm:$0xff]   ;;  %v1250_v16 = vld [vmem:[%s1659_s8 + $0x20] sm:$0xff]   ;;  %s1348_s4 = sshll.u32 %s1437_s19, 4  ;;  %s1349_s4 = int_to_ptr.vmem [resolvable:$false] %s1348_s4 }
  0x72   : > { %1086 = vmatpush3.bf16.msra.mxu0 %v1235_v1  ;;  %1140 = vmatpush3.bf16.msra.mxu1 %v1235_v1  ;;  %v1251_v17 = vld [vmem:[%s1659_s8 + $0x60] sm:$0xff]   ;;  %v1252_v18 = vld [vmem:[%s1659_s8 + $0x28] sm:$0xff]   ;;  %v1254_v20 = vld [vmem:[%s1659_s8 + $0x30] sm:$0xff]   ;;  %p1346_p1 = pnand %p1345_p8, %p1828_p12  ;;  %s1350_s21 = scalar_lea.vmem %s1349_s4, 8192 }
  0x73   : > { %1087 = vmatprep.subr.bf16.mxu0 %v1236_v2  ;;  %1133 = vmatprep.subr.bf16.mxu1 %v1236_v2  ;;  %v1253_v19 = vld [vmem:[%s1659_s8 + $0x68] sm:$0xff]   ;;  %v1255_v21 = vld [vmem:[%s1659_s8 + $0x70] sm:$0xff]   ;;  %v1256_v22 = vld [vmem:[%s1659_s8 + $0x38] sm:$0xff]   ;;  %p1351_p3 = scmp.lt.s32.totalorder %s1755_s11, %s1349_s4  ;;  %p1352_p5 = scmp.lt.s32.totalorder %s1350_s21, %s1344_s10 }
  0x74   : > { %v1257_v23 = vld [vmem:[%s1659_s8 + $0x78] sm:$0xff]   ;;  %v1685_v24 = vld [vmem:[#allocation8] ss:$0 sm:$0xff]  ;;  %p1347_p10 = pneg %p1346_p1 }
  0x75   : > { %p1353_p9 = por %p1352_p5, %p1351_p3 }
  0x76   : > { %1088 = vmatpush3.bf16.msra.mxu0 %v1236_v2  ;;  %1141 = vmatpush3.bf16.msra.mxu1 %v1236_v2 }
  0x77   : > { %1089 = vmatprep.subr.bf16.mxu0 %v1237_v3  ;;  %1134 = vmatprep.subr.bf16.mxu1 %v1237_v3  ;;  %p1354_p11 = pnand %p1353_p9, %p1347_p10 }
  0x7a   : > { %1090 = vmatpush3.bf16.msra.mxu0 %v1237_v3  ;;  %1142 = vmatpush3.bf16.msra.mxu1 %v1237_v3 }
  0x7b   : > { %1091 = vmatprep.subr.bf16.mxu0 %v1238_v6  ;;  %1135 = vmatprep.subr.bf16.mxu1 %v1238_v6 }
  0x7e   : > { %1092 = vmatpush3.bf16.msra.mxu0 %v1238_v6  ;;  %1143 = vmatpush3.bf16.msra.mxu1 %v1238_v6 }
  0x7f   : > { %1093 = vmatprep.subr.bf16.mxu0 %v1239_v7  ;;  %1136 = vmatprep.subr.bf16.mxu1 %v1239_v7 }
  0x82   : > { %1094 = vmatpush3.bf16.msra.mxu0 %v1239_v7  ;;  %1144 = vmatpush3.bf16.msra.mxu1 %v1239_v7 }
  0x83   : > { %1095 = vmatprep.subr.bf16.mxu0 %v1240_v8  ;;  %1137 = vmatprep.subr.bf16.mxu1 %v1240_v8 }
  0x86   : > { %1096 = vmatpush3.bf16.msra.mxu0 %v1240_v8  ;;  %1145 = vmatpush3.bf16.msra.mxu1 %v1240_v8 }
  0x87   : > { %1097 = vmatprep.subr.bf16.mxu0 %v1241_v9  ;;  %1138 = vmatprep.subr.bf16.mxu1 %v1241_v9 }
  0x8a   : > { %1098 = vmatpush3.bf16.msra.mxu0 %v1241_v9  ;;  %1146 = vmatpush3.bf16.msra.mxu1 %v1241_v9 }
  0x8d   : > { %1100 = vmatmul.mubr.bf16.vlgmr.msra.gmra.mrb[0].mxu0 %v1244_v10  ;;  %1116 = vmatmul.mubr.bf16.vlgmr.msra.gmra.mrb[0].mxu1 %v1245_v11 }
  0x8e   : > { %1103 = vmatprep.mubr.bf16.mxu0 %v1246_v12  ;;  %1119 = vmatprep.mubr.bf16.mxu1 %v1247_v13 }
  0x95   : > { %1104 = vmatmul.mubr.bf16.gmra.mrb[4].mxu0 %v1248_v14  ;;  %1120 = vmatmul.mubr.bf16.gmra.mrb[4].mxu1 %v1249_v15 }
  0x96   : > { %1107 = vmatprep.mubr.bf16.mxu0 %v1250_v16  ;;  %1123 = vmatprep.mubr.bf16.mxu1 %v1251_v17 }
  0x9d   : > { %1108 = vmatmul.mubr.bf16.gmra.mrb[8].mxu0 %v1252_v18  ;;  %1124 = vmatmul.mubr.bf16.gmra.mrb[8].mxu1 %v1253_v19 }
  0x9e   : > { %1111 = vmatprep.mubr.bf16.mxu0 %v1254_v20  ;;  %1127 = vmatprep.mubr.bf16.mxu1 %v1255_v21 }
  0xa5   : > { %1112 = vmatmul.mubr.bf16.gmra.mrb[12].mxu0 %v1256_v22  ;;  %1128 = vmatmul.mubr.bf16.gmra.mrb[12].mxu1 %v1257_v23 }
 0x160   : > { %v1101_v25 = vpop.f32.mrb[0].mxu0  ;;  %v1117_v26 = vpop.f32.mrb[0].mxu1 }
 0x161   : > { %v791_v27 = vadd.f32 %v1101_v25, %v1685_v24  ;;  %v807_v28 = vadd.f32 %v1117_v26, %v1685_v24  ;;  %v556_v29 = vpop.f32.mrb[1].mxu0  ;;  %v620_v30 = vpop.f32.mrb[1].mxu1 }
 0x162   : > { %v789_v31 = vadd.f32 %v1685_v24, %v556_v29  ;;  %v805_v32 = vadd.f32 %v1685_v24, %v620_v30  ;;  %v1102_v33 = vpop.f32.mrb[2].mxu0  ;;  %v1118_v34 = vpop.f32.mrb[2].mxu1 }
 0x163   : > { %v823_v35 = vmax.f32 %v791_v27, 0.0  ;;  %v839_v36 = vmax.f32 %v807_v28, 0.0  ;;  %v792_v37 = vadd.f32 %v1102_v33, %v1685_v24  ;;  %v808_v38 = vadd.f32 %v1118_v34, %v1685_v24  ;;  %v559_v39 = vpop.f32.mrb[3].mxu0  ;;  %v623_v40 = vpop.f32.mrb[3].mxu1 }
 0x164   : > { %v821_v41 = vmax.f32 %v789_v31, 0.0  ;;  %v837_v42 = vmax.f32 %v805_v32, 0.0  ;;  %v790_v43 = vadd.f32 %v1685_v24, %v559_v39  ;;  %v806_v44 = vadd.f32 %v1685_v24, %v623_v40 }
 0x165   : > { %855 = vst [vmem:[%s1696_s22 + $0x10] sm:$0xff] %v823_v35  ;;  %871 = vst [vmem:[%s1696_s22 + $0x90] sm:$0xff] %v839_v36  ;;  %v824_v45 = vmax.f32 %v792_v37, 0.0  ;;  %v840_v46 = vmax.f32 %v808_v38, 0.0 }
 0x166   : > { %853 = vst [vmem:[%s1696_s22] sm:$0xff] %v821_v41  ;;  %869 = vst [vmem:[%s1696_s22 + $0x80] sm:$0xff] %v837_v42  ;;  %v822_v47 = vmax.f32 %v790_v43, 0.0  ;;  %v838_v48 = vmax.f32 %v806_v44, 0.0 }
 0x167   : > { %856 = vst [vmem:[%s1696_s22 + $0x18] sm:$0xff] %v824_v45  ;;  %872 = vst [vmem:[%s1696_s22 + $0x98] sm:$0xff] %v840_v46 }
 0x168   : > { %854 = vst [vmem:[%s1696_s22 + $0x8] sm:$0xff] %v822_v47  ;;  %870 = vst [vmem:[%s1696_s22 + $0x88] sm:$0xff] %v838_v48  ;;  %v1105_v49 = vpop.f32.mrb[4].mxu0  ;;  %v1121_v50 = vpop.f32.mrb[4].mxu1 }
 0x169   : > { %v795_v51 = vadd.f32 %v1105_v49, %v1685_v24  ;;  %v811_v52 = vadd.f32 %v1121_v50, %v1685_v24  ;;  %v572_v53 = vpop.f32.mrb[5].mxu0  ;;  %v636_v54 = vpop.f32.mrb[5].mxu1 }
 0x16a   : > { %v793_v55 = vadd.f32 %v1685_v24, %v572_v53  ;;  %v809_v56 = vadd.f32 %v1685_v24, %v636_v54  ;;  %v1106_v57 = vpop.f32.mrb[6].mxu0  ;;  %v1122_v58 = vpop.f32.mrb[6].mxu1 }
 0x16b   : > { %v827_v59 = vmax.f32 %v795_v51, 0.0  ;;  %v843_v60 = vmax.f32 %v811_v52, 0.0  ;;  %v796_v61 = vadd.f32 %v1106_v57, %v1685_v24  ;;  %v812_v62 = vadd.f32 %v1122_v58, %v1685_v24  ;;  %v575_v63 = vpop.f32.mrb[7].mxu0  ;;  %v639_v0 = vpop.f32.mrb[7].mxu1 }
 0x16c   : > { %v825_v1 = vmax.f32 %v793_v55, 0.0  ;;  %v841_v2 = vmax.f32 %v809_v56, 0.0  ;;  %v794_v3 = vadd.f32 %v1685_v24, %v575_v63  ;;  %v810_v4 = vadd.f32 %v1685_v24, %v639_v0 }
 0x16d   : > { %859 = vst [vmem:[%s1696_s22 + $0x30] sm:$0xff] %v827_v59  ;;  %875 = vst [vmem:[%s1696_s22 + $0xb0] sm:$0xff] %v843_v60  ;;  %v828_v5 = vmax.f32 %v796_v61, 0.0  ;;  %v844_v6 = vmax.f32 %v812_v62, 0.0 }
 0x16e   : > { %857 = vst [vmem:[%s1696_s22 + $0x20] sm:$0xff] %v825_v1  ;;  %873 = vst [vmem:[%s1696_s22 + $0xa0] sm:$0xff] %v841_v2  ;;  %v826_v7 = vmax.f32 %v794_v3, 0.0  ;;  %v842_v8 = vmax.f32 %v810_v4, 0.0 }
 0x16f   : > { %860 = vst [vmem:[%s1696_s22 + $0x38] sm:$0xff] %v828_v5  ;;  %876 = vst [vmem:[%s1696_s22 + $0xb8] sm:$0xff] %v844_v6 }
 0x170   : > { %858 = vst [vmem:[%s1696_s22 + $0x28] sm:$0xff] %v826_v7  ;;  %874 = vst [vmem:[%s1696_s22 + $0xa8] sm:$0xff] %v842_v8  ;;  %v1109_v9 = vpop.f32.mrb[8].mxu0  ;;  %v1125_v10 = vpop.f32.mrb[8].mxu1 }
 0x171   : > { %v799_v11 = vadd.f32 %v1109_v9, %v1685_v24  ;;  %v815_v12 = vadd.f32 %v1125_v10, %v1685_v24  ;;  %v588_v13 = vpop.f32.mrb[9].mxu0  ;;  %v652_v14 = vpop.f32.mrb[9].mxu1 }
 0x172   : > { %v797_v15 = vadd.f32 %v1685_v24, %v588_v13  ;;  %v813_v16 = vadd.f32 %v1685_v24, %v652_v14  ;;  %v1110_v17 = vpop.f32.mrb[10].mxu0  ;;  %v1126_v18 = vpop.f32.mrb[10].mxu1 }
 0x173   : > { %v831_v19 = vmax.f32 %v799_v11, 0.0  ;;  %v847_v20 = vmax.f32 %v815_v12, 0.0  ;;  %v800_v21 = vadd.f32 %v1110_v17, %v1685_v24  ;;  %v816_v22 = vadd.f32 %v1126_v18, %v1685_v24  ;;  %v591_v23 = vpop.f32.mrb[11].mxu0  ;;  %v655_v25 = vpop.f32.mrb[11].mxu1 }
 0x174   : > { %v829_v26 = vmax.f32 %v797_v15, 0.0  ;;  %v845_v27 = vmax.f32 %v813_v16, 0.0  ;;  %v798_v28 = vadd.f32 %v1685_v24, %v591_v23  ;;  %v814_v29 = vadd.f32 %v1685_v24, %v655_v25 }
 0x175   : > { %863 = vst [vmem:[%s1696_s22 + $0x50] sm:$0xff] %v831_v19  ;;  %879 = vst [vmem:[%s1696_s22 + $0xd0] sm:$0xff] %v847_v20  ;;  %v832_v30 = vmax.f32 %v800_v21, 0.0  ;;  %v848_v31 = vmax.f32 %v816_v22, 0.0 }
 0x176   : > { %861 = vst [vmem:[%s1696_s22 + $0x40] sm:$0xff] %v829_v26  ;;  %877 = vst [vmem:[%s1696_s22 + $0xc0] sm:$0xff] %v845_v27  ;;  %v830_v32 = vmax.f32 %v798_v28, 0.0  ;;  %v846_v33 = vmax.f32 %v814_v29, 0.0 }
 0x177   : > { %864 = vst [vmem:[%s1696_s22 + $0x58] sm:$0xff] %v832_v30  ;;  %880 = vst [vmem:[%s1696_s22 + $0xd8] sm:$0xff] %v848_v31 }
 0x178   : > { %862 = vst [vmem:[%s1696_s22 + $0x48] sm:$0xff] %v830_v32  ;;  %878 = vst [vmem:[%s1696_s22 + $0xc8] sm:$0xff] %v846_v33  ;;  %v1113_v34 = vpop.f32.mrb[12].mxu0  ;;  %v1129_v35 = vpop.f32.mrb[12].mxu1 }
 0x179   : > { %v803_v36 = vadd.f32 %v1113_v34, %v1685_v24  ;;  %v819_v37 = vadd.f32 %v1129_v35, %v1685_v24  ;;  %v604_v38 = vpop.f32.mrb[13].mxu0  ;;  %v668_v39 = vpop.f32.mrb[13].mxu1 }
 0x17a   : > { %v801_v40 = vadd.f32 %v1685_v24, %v604_v38  ;;  %v817_v41 = vadd.f32 %v1685_v24, %v668_v39  ;;  %v1114_v42 = vpop.f32.mrb[14].mxu0  ;;  %v1130_v43 = vpop.f32.mrb[14].mxu1 }
 0x17b   : > { %v835_v44 = vmax.f32 %v803_v36, 0.0  ;;  %v851_v45 = vmax.f32 %v819_v37, 0.0  ;;  %v804_v46 = vadd.f32 %v1114_v42, %v1685_v24  ;;  %v820_v47 = vadd.f32 %v1130_v43, %v1685_v24  ;;  %v607_v48 = vpop.f32.mrb[15].mxu0  ;;  %v671_v49 = vpop.f32.mrb[15].mxu1 }
 0x17c   : > { %v833_v50 = vmax.f32 %v801_v40, 0.0  ;;  %v849_v51 = vmax.f32 %v817_v41, 0.0  ;;  %v802_v52 = vadd.f32 %v1685_v24, %v607_v48  ;;  %v818_v53 = vadd.f32 %v1685_v24, %v671_v49 }
 0x17d   : > { %867 = vst [vmem:[%s1696_s22 + $0x70] sm:$0xff] %v835_v44  ;;  %883 = vst [vmem:[%s1696_s22 + $0xf0] sm:$0xff] %v851_v45  ;;  %v836_v54 = vmax.f32 %v804_v46, 0.0  ;;  %v852_v55 = vmax.f32 %v820_v47, 0.0 }
 0x17e   : > { %865 = vst [vmem:[%s1696_s22 + $0x60] sm:$0xff] %v833_v50  ;;  %881 = vst [vmem:[%s1696_s22 + $0xe0] sm:$0xff] %v849_v51  ;;  %v834_v56 = vmax.f32 %v802_v52, 0.0  ;;  %v850_v57 = vmax.f32 %v818_v53, 0.0 }
 0x17f   : > { %868 = vst [vmem:[%s1696_s22 + $0x78] sm:$0xff] %v836_v54  ;;  %884 = vst [vmem:[%s1696_s22 + $0xf8] sm:$0xff] %v852_v55 }
 0x180   : > { %866 = vst [vmem:[%s1696_s22 + $0x68] sm:$0xff] %v834_v56  ;;  %882 = vst [vmem:[%s1696_s22 + $0xe8] sm:$0xff] %v850_v57 }
 0x181   : > { %1357 = shalt.err (!%p1354_p11)
}
 0x182   : > { %s1358_s30 = scalar_lea.hbm %s1753_s26, 4096  ;;  %s1362_s7 = scalar_lea.hbm %s1813_s3, 8192 }
 0x183   : > { %p1359_p0 = scmp.ne.s32.totalorder %s1753_s26, %s1358_s30  ;;  %p1363_p6 = scmp.lt.u32.totalorder %s1753_s26, %s1813_s3 }
 0x184   : > { %p1364_p7 = scmp.lt.u32.totalorder %s1362_s7, %s1358_s30  ;;  %p1366_p8 = scmp.lt.u32.totalorder %s1358_s30, %s1753_s26 }
 0x185   : > { %p1360_p4 = pnand %p1359_p0, %p1828_p12 }
 0x186   : > { %p1365_p2 = por %p1364_p7, %p1363_p6 }
 0x187   : > { %p1361_p13 = pneg %p1360_p4 }
 0x188   : > { %p1367_p1 = por %p1366_p8, %p1365_p2 }
 0x18a   : > { %p1368_p10 = pnand %p1367_p1, %p1361_p13 }
 0x18c   : > { %1371 = shalt.err (!%p1368_p10)
}
 0x18d   : > { %s1438_s22 = smov 128   ;;  %s1439_s24 = smov 8  }
 0x18e   : > { %1157 = dma.vmem_to_hbm [thread:$0]  (%p1828_p12), %s1755_s11, 4096, %s1753_s26, %s886_s9, %s1438_s22, %s1438_s22, %s1439_s24  }
 0x18f PF: > { %s915_s15 = sand.u32 1, %s1410_s12   ;;  %p1829_p3 = scmp.ne.s32.totalorder %s1821_s23, 0 }
 0x190   : > { %p1830_p5 = scmp.ge.s32.totalorder %s1430_s17, 2  ;;  %s916_s18 = scalar_lea.sflag [#allocation5], %s915_s15 }
 0x192   : > { %p1171_p9 = pnand %p1830_p5, %p1829_p3 }
 0x194   : > { %1405 = dma.done.wait (!%p1171_p9), %s916_s18, 4096  }
 0x195   : > { %1407 = vsyncadd (!%p1171_p9), %s916_s18, 4294963200  ;;  %s20_s17 = sadd.s32 1, %s1430_s17   ;;  %s1831_s12 = smov %s1414_s13 }
 0x196   : > { %p17_p11 = scmp.ge.s32.totalorder %s20_s17, 4   ;;  %s1832_s13 = smov %s1418_s14 }
 0x197   : > { %s1833_s14 = smov %s1606_s6  ;;  %s1834_s15 = smov %s1426_s16 }
 0x198   : > { %s1835_s16 = smov %s1837_s25  ;;  %19 = sbr.rel (!%p17_p11) target bundleno = 7 (0x7), region = 95 }
 0x19f   :  { %921 = vsyncpa [#allocation4], 1 }
 0x1a0   :  { %923 = vsyncpa [#allocation4 + $0x1], 1 }
 0x1a1   :  { %924 = vsyncpa [#allocation7], 1 }
 0x1a2   :  { %925 = vsyncpa [#allocation5], 1 }
 0x1a3   :  { %927 = vsyncpa [#allocation5 + $0x1], 1 }

</bundles_post_ra>
